<compile_context>
chip_gen: v6e
topology: v6e:2x2x1
jax: 0.10.0
libtpu: 0.0.40
codegen_flags: <defaults>
</compile_context>

<pallas_src>
import math

import jax
import jax.numpy as jnp
from jax.experimental import pallas as pl
from jax.experimental.pallas import tpu as pltpu


# -----------------------------------------------------------------------------
# Tiled linear kernel (used for the LSTM input projection and the affine path)
# -----------------------------------------------------------------------------
def _linear_kernel(x_ref, w_ref, b_ref, o_ref):
    """One (TILE_M, TILE_N) output tile of y = x @ w + b (f32 accumulation)."""
    o_ref[...] = (
        jnp.dot(x_ref[...], w_ref[...], preferred_element_type=jnp.float32)
        + b_ref[...]
    ).astype(o_ref.dtype)


def linear_pallas(x2, w_t, bias, *, out_dtype=None, tile_m=512, tile_n=512):
    """y = x2 @ w_t + bias.   x2: (M, K), w_t: (K, N), bias: (1, N)."""
    M, K = x2.shape
    N = w_t.shape[1]
    out_dtype = out_dtype or x2.dtype
    tm = M if M <= tile_m else tile_m      # full-dim or multiple of 8
    tn = N if N <= tile_n else tile_n      # full-dim or multiple of 128
    grid = (pl.cdiv(M, tm), pl.cdiv(N, tn))
    return pl.pallas_call(
        _linear_kernel,
        out_shape=jax.ShapeDtypeStruct((M, N), out_dtype),
        grid_spec=pltpu.PrefetchScalarGridSpec(
            num_scalar_prefetch=0,
            grid=grid,
            in_specs=[
                pl.BlockSpec((tm, K), lambda i, j: (i, 0)),
                pl.BlockSpec((K, tn), lambda i, j: (0, j)),
                pl.BlockSpec((1, tn), lambda i, j: (0, j)),
            ],
            out_specs=pl.BlockSpec((tm, tn), lambda i, j: (i, j)),
        ),
        compiler_params=pltpu.CompilerParams(
            dimension_semantics=("parallel", "parallel"),
            vmem_limit_bytes=32 * 1024 * 1024,
        ),
    )(x2, w_t, bias)


def affine_pallas(x, weight, bias):
    """nn.Linear forward. x: (..., H_in), weight: (H_out, H_in), bias: (H_out,)."""
    orig_shape = x.shape
    H_in = orig_shape[-1]
    H_out = weight.shape[0]
    x2 = x.reshape(-1, H_in)
    out = linear_pallas(
        x2,
        jnp.asarray(weight).T,
        jnp.asarray(bias).reshape(1, H_out).astype(jnp.float32),
        out_dtype=x.dtype,
    )
    return out.reshape(orig_shape[:-1] + (H_out,))


# -----------------------------------------------------------------------------
# Fused (multi-direction) chunked LSTM recurrence kernel
# -----------------------------------------------------------------------------
def _make_lstm_chunk_kernel(ndir, hidden):
    """Build the recurrent LSTM kernel for `ndir` directions (1 or 2).

    Ref layout (inputs, outputs, scratch):
      gx_refs[d] : (T_CHUNK, B, 4H)  precomputed x-projection gate preacts
                   (combined bias folded in).  Direction 1's blocks arrive
                   time-reversed via its BlockSpec index_map.
      whh_ref    : (ndir, H, 4H)     hidden->gate weights (pre-transposed);
                   constant index_map -> DMA'd once, stays resident.
      out_refs[d]: (T_CHUNK, B, H)   per-direction hidden states for the chunk.
      h_scr,c_scr: (ndir, B, H) f32  recurrent state carried across grid steps.
    Gate order matches PyTorch: i, f, g, o.
    """
    H = hidden

    def kernel(*refs):
        gx_refs = refs[:ndir]
        whh_ref = refs[ndir]
        out_refs = refs[ndir + 1:2 * ndir + 1]
        h_scr = refs[2 * ndir + 1]
        c_scr = refs[2 * ndir + 2]

        t_chunk = gx_refs[0].shape[0]

        @pl.when(pl.program_id(0) == 0)
        def _init():
            h_scr[...] = jnp.zeros_like(h_scr)
            c_scr[...] = jnp.zeros_like(c_scr)

        # Hidden->gate weights: load the per-direction slabs once per chunk
        # (they live in VMEM across the whole grid anyway).
        whh = [whh_ref[d] for d in range(ndir)]            # each (H, 4H)

        def step(j, carry):
            # Direction 0 walks the chunk forward; direction 1 walks it
            # backward (its blocks are already time-reversed by its index_map),
            # so both recurrences advance together in one grid sweep.
            for d in range(ndir):
                slot = j if d == 0 else t_chunk - 1 - j
                gx = gx_refs[d][slot].astype(jnp.float32)             # (B, 4H)
                h_prev = h_scr[d]
                c_prev = c_scr[d]
                rec = jnp.dot(h_prev.astype(whh[d].dtype), whh[d],
                              preferred_element_type=jnp.float32)     # (B, 4H)
                gates = gx + rec
                # Gate math stays in f32 (v5e VPU/EUP have no bf16 path anyway);
                # sigmoid/tanh go to the EUP slot, in parallel with the MXU.
                i = jax.nn.sigmoid(gates[:, 0 * H:1 * H])
                f = jax.nn.sigmoid(gates[:, 1 * H:2 * H])
                g = jnp.tanh(gates[:, 2 * H:3 * H])
                o = jax.nn.sigmoid(gates[:, 3 * H:4 * H])
                c = f * c_prev + i * g
                h = o * jnp.tanh(c)
                h_scr[d] = h
                c_scr[d] = c
                out_refs[d][slot] = h.astype(out_refs[d].dtype)
            return carry

        jax.lax.fori_loop(0, t_chunk, step, 0, unroll=True)

    return kernel


def _time_chunk(T, max_chunk):
    """Largest divisor of T that is <= max_chunk (chunk must divide T exactly)."""
    for c in range(min(T, max_chunk), 0, -1):
        if T % c == 0:
            return c
    return 1


def lstm_layer_pallas(x_tm, dir_params, *, compute_dtype=jnp.float32,
                      max_chunk=8):
    """One (optionally bidirectional) LSTM layer over a time-major sequence.

    x_tm       : (T, B, D_in) time-major layer input.
    dir_params : list (len 1 or 2) of dicts with PyTorch-layout weights:
                 w_ih (4H, D_in), w_hh (4H, H), b_ih (4H,), b_hh (4H,).
    Returns (T, B, ndir * H) hidden states for every timestep.
    """
    T, B, D_in = x_tm.shape
    ndir = len(dir_params)
    H = dir_params[0]["w_hh"].shape[1]
    H4 = 4 * H

    # --- (1) time-parallel input projection: ONE big MXU matmul for all
    #     timesteps and all directions (rows = T*B), combined bias folded in.
    w_cat = jnp.concatenate(
        [jnp.asarray(p["w_ih"]).T for p in dir_params], axis=1)   # (D_in, ndir*4H)
    b_cat = jnp.concatenate(
        [p["b_ih"] + p["b_hh"] for p in dir_params]
    ).reshape(1, ndir * H4).astype(jnp.float32)
    gates_x = linear_pallas(
        x_tm.reshape(T * B, D_in).astype(compute_dtype),
        w_cat.astype(compute_dtype),
        b_cat,
        out_dtype=jnp.float32,
    ).reshape(T, B, ndir * H4)

    # --- (2) recurrent part: only h @ W_hh remains in the serial time loop.
    whh = jnp.stack(
        [jnp.asarray(p["w_hh"]).T for p in dir_params], axis=0
    ).astype(compute_dtype)                                       # (ndir, H, 4H)

    t_chunk = _time_chunk(T, max_chunk)
    num_chunks = T // t_chunk

    # Direction selection and (for dir 1) time reversal are expressed purely
    # via BlockSpec index_maps on the SAME gates_x array: no jnp.split and no
    # materialized x[::-1] / out[::-1] HBM copies.  The last-axis block index
    # (block size 4H over a 2*4H array) picks the direction's gate slab.
    gx_specs = [pl.BlockSpec((t_chunk, B, H4), lambda c: (c, 0, 0))]
    out_specs = [pl.BlockSpec((t_chunk, B, H), lambda c: (c, 0, 0))]
    if ndir == 2:
        gx_specs.append(pl.BlockSpec((t_chunk, B, H4),
                                     lambda c: (num_chunks - 1 - c, 0, 1)))
        out_specs.append(pl.BlockSpec((t_chunk, B, H),
                                      lambda c: (num_chunks - 1 - c, 0, 0)))
    whh_spec = pl.BlockSpec((ndir, H, H4), lambda c: (0, 0, 0))

    outs = pl.pallas_call(
        _make_lstm_chunk_kernel(ndir, H),
        out_shape=[jax.ShapeDtypeStruct((T, B, H), x_tm.dtype)
                   for _ in range(ndir)],
        grid_spec=pltpu.PrefetchScalarGridSpec(
            num_scalar_prefetch=0,
            grid=(num_chunks,),
            in_specs=gx_specs + [whh_spec],
            out_specs=out_specs,
            scratch_shapes=[
                pltpu.VMEM((ndir, B, H), jnp.float32),   # h state (f32)
                pltpu.VMEM((ndir, B, H), jnp.float32),   # c state (f32)
            ],
        ),
        compiler_params=pltpu.CompilerParams(
            # Time recurrence is sequential: MUST stay "arbitrary".
            dimension_semantics=("arbitrary",),
            vmem_limit_bytes=32 * 1024 * 1024,
        ),
    )(*([gates_x] * ndir), whh)

    if ndir == 1:
        return outs[0]
    return jnp.concatenate(list(outs), axis=-1)   # (T, B, 2H)


# -----------------------------------------------------------------------------
# EncoderRNN module (JAX/Pallas port)
# -----------------------------------------------------------------------------
class EncoderRNN:
    def __init__(self, model_type, num_units, num_units_out, nlayers, bidir,
                 dropout, key, compute_dtype=jnp.float32, max_chunk=8):
        self.model_type = model_type
        self.bidir = bidir
        self.nlayers = nlayers
        self.compute_dtype = compute_dtype   # MXU operand dtype (f32 or bf16)
        self.max_chunk = max_chunk           # timesteps per grid step
        self.params = {}

        if model_type == "lstm":
            H = num_units_out // 2 if bidir else num_units_out
            self.hidden = H
            ndir = 2 if bidir else 1
            bound = 1.0 / math.sqrt(H)
            layers = []
            for layer in range(nlayers):
                in_size = num_units if layer == 0 else H * ndir
                dirs = []
                for _d in range(ndir):
                    key, k0, k1, k2, k3 = jax.random.split(key, 5)
                    dirs.append(dict(
                        w_ih=jax.random.uniform(k0, (4 * H, in_size),
                                                minval=-bound, maxval=bound,
                                                dtype=jnp.float32),
                        w_hh=jax.random.uniform(k1, (4 * H, H),
                                                minval=-bound, maxval=bound,
                                                dtype=jnp.float32),
                        b_ih=jax.random.uniform(k2, (4 * H,),
                                                minval=-bound, maxval=bound,
                                                dtype=jnp.float32),
                        b_hh=jax.random.uniform(k3, (4 * H,),
                                                minval=-bound, maxval=bound,
                                                dtype=jnp.float32),
                    ))
                layers.append(dirs)
            self.params["layers"] = layers
        elif model_type == "gru":
            # TODO(synk): GRU cell not implemented in this port.
            raise NotImplementedError("gru cell not ported")
        elif model_type == "affine":
            bound = 1.0 / math.sqrt(num_units)
            key, k0, k1 = jax.random.split(key, 3)
            self.params["weight"] = jax.random.uniform(
                k0, (num_units, num_units), minval=-bound, maxval=bound,
                dtype=jnp.float32)
            self.params["bias"] = jax.random.uniform(
                k1, (num_units,), minval=-bound, maxval=bound,
                dtype=jnp.float32)
        else:
            raise NotImplementedError

    def __call__(self, x, input_len=None, return_last=False):
        if self.model_type == "affine":
            return affine_pallas(x, self.params["weight"], self.params["bias"])
        if input_len is not None:
            # TODO(synk): packed/ragged sequence (input_len / return_last) path
            #             not ported.
            raise NotImplementedError("input_len path not ported")

        # x: (B, T, H_in) batch-first (PyTorch convention) -> time-major once.
        x_tm = jnp.transpose(x, (1, 0, 2))          # (T, B, H_in)
        for layer_dirs in self.params["layers"]:
            x_tm = lstm_layer_pallas(
                x_tm, layer_dirs,
                compute_dtype=self.compute_dtype,
                max_chunk=self.max_chunk)
        return jnp.transpose(x_tm, (1, 0, 2))       # back to (B, T, H_out)


# -----------------------------------------------------------------------------
# Pure-JAX reference (for correctness check)
# -----------------------------------------------------------------------------
def _lstm_direction_ref(x_tm, w_ih, w_hh, b_ih, b_hh):
    T, B, _ = x_tm.shape
    H = w_ih.shape[0] // 4

    def step(carry, x_t):
        h, c = carry
        gates = x_t @ w_ih.T + h @ w_hh.T + b_ih + b_hh
        i, f, g, o = jnp.split(gates, 4, axis=-1)
        i, f, o = jax.nn.sigmoid(i), jax.nn.sigmoid(f), jax.nn.sigmoid(o)
        g = jnp.tanh(g)
        c = f * c + i * g
        h = o * jnp.tanh(c)
        return (h, c), h

    init = (jnp.zeros((B, H), jnp.float32), jnp.zeros((B, H), jnp.float32))
    _, ys = jax.lax.scan(step, init, x_tm)
    return ys


def _encoder_ref(enc, x):
    x_tm = jnp.transpose(x, (1, 0, 2))
    for layer_dirs in enc.params["layers"]:
        p0 = layer_dirs[0]
        outs = [_lstm_direction_ref(x_tm, p0["w_ih"], p0["w_hh"],
                                    p0["b_ih"], p0["b_hh"])]
        if enc.bidir:
            p1 = layer_dirs[1]
            outs.append(_lstm_direction_ref(x_tm[::-1], p1["w_ih"], p1["w_hh"],
                                            p1["b_ih"], p1["b_hh"])[::-1])
        x_tm = jnp.concatenate(outs, axis=-1)
    return jnp.transpose(x_tm, (1, 0, 2))


# -----------------------------------------------------------------------------
if __name__ == "__main__":
    key = jax.random.PRNGKey(0)
    key, k_p, k_x, k_pu, k_xu, k_pa, k_xa = jax.random.split(key, 7)

    # ---- bidirectional, 2-layer LSTM (lane-aligned hidden H = 128) ----
    B, T, num_units, num_units_out = 4, 16, 128, 256
    enc = EncoderRNN("lstm", num_units, num_units_out, nlayers=2, bidir=True,
                     dropout=0.0, key=k_p)
    x = jax.random.normal(k_x, (B, T, num_units), dtype=jnp.float32)

    out = jax.block_until_ready(enc(x))
    assert out.shape == (B, T, num_units_out), out.shape
    ref = _encoder_ref(enc, x)
    err = float(jnp.max(jnp.abs(out - ref)))
    assert err < 2e-3, f"f32 bidir LSTM mismatch: {err}"

    # Same params, bf16 MXU operands (weights + activations); f32 state/gates.
    enc.compute_dtype = jnp.bfloat16
    out_bf16 = jax.block_until_ready(enc(x))
    err_bf16 = float(jnp.max(jnp.abs(out_bf16 - ref)))
    assert err_bf16 < 1e-1, f"bf16 bidir LSTM mismatch: {err_bf16}"
    enc.compute_dtype = jnp.float32

    # ---- unidirectional, single-layer LSTM ----
    enc_uni = EncoderRNN("lstm", 128, 128, nlayers=1, bidir=False,
                         dropout=0.0, key=k_pu)
    xu = jax.random.normal(k_xu, (2, 12, 128), dtype=jnp.float32)
    out_uni = jax.block_until_ready(enc_uni(xu))
    assert out_uni.shape == (2, 12, 128), out_uni.shape
    ref_uni = _encoder_ref(enc_uni, xu)
    err_uni = float(jnp.max(jnp.abs(out_uni - ref_uni)))
    assert err_uni < 2e-3, f"f32 unidir LSTM mismatch: {err_uni}"

    # ---- affine path (nn.Linear(num_units, num_units)) ----
    enc_aff = EncoderRNN("affine", 128, 256, nlayers=1, bidir=False,
                         dropout=0.0, key=k_pa)
    xa = jax.random.normal(k_xa, (2, 8, 128), dtype=jnp.float32)
    out_aff = jax.block_until_ready(enc_aff(xa))
    assert out_aff.shape == (2, 8, 128), out_aff.shape
    ref_aff = xa @ enc_aff.params["weight"].T + enc_aff.params["bias"]
    err_aff = float(jnp.max(jnp.abs(out_aff - ref_aff)))
    assert err_aff < 2e-3, f"affine mismatch: {err_aff}"

    print("KERNEL_OK")
</pallas_src>

<mosaic_0001>
module attributes {stable_mosaic.version = 11 : i64} {
  func.func @_linear_kernel(%arg0: i32, %arg1: i32, %arg2: memref<64x128xf32, #tpu.memory_space<vmem>>, %arg3: memref<128x512xf32, #tpu.memory_space<vmem>>, %arg4: memref<1x512xf32, #tpu.memory_space<vmem>>, %arg5: memref<64x512xf32, #tpu.memory_space<vmem>>) attributes {dimension_semantics = [#tpu.dimension_semantics<parallel>, #tpu.dimension_semantics<parallel>], iteration_bounds = array<i64: 1, 2>, scalar_prefetch = 0 : i64, scratch_operands = 0 : i64, tpu.core_type = #tpu.core_type<tc>, window_params = [{transform_indices = @transform_0, window_bounds = array<i64: 64, 128>}, {transform_indices = @transform_1, window_bounds = array<i64: 128, 512>}, {transform_indices = @transform_2, window_bounds = array<i64: 1, 512>}, {transform_indices = @transform_3, window_bounds = array<i64: 64, 512>}]} {
    %c0 = arith.constant 0 : index
    %c0_0 = arith.constant 0 : index
    %0 = vector.load %arg2[%c0, %c0_0] : memref<64x128xf32, #tpu.memory_space<vmem>>, vector<64x128xf32>
    %c0_1 = arith.constant 0 : index
    %c0_2 = arith.constant 0 : index
    %1 = vector.load %arg3[%c0_1, %c0_2] : memref<128x512xf32, #tpu.memory_space<vmem>>, vector<128x512xf32>
    %cst = arith.constant dense<0.000000e+00> : vector<64x512xf32>
    %2 = tpu.matmul %0, %1, %cst {dimension_numbers = #tpu.dot_dimension_numbers<[1], [0], [0], [1], [0, 0, 1, 1], [], []>} : vector<64x128xf32>, vector<128x512xf32>, vector<64x512xf32> -> vector<64x512xf32>
    %c0_3 = arith.constant 0 : index
    %c0_4 = arith.constant 0 : index
    %3 = vector.load %arg4[%c0_3, %c0_4] : memref<1x512xf32, #tpu.memory_space<vmem>>, vector<1x512xf32>
    %4 = vector.broadcast %3 : vector<1x512xf32> to vector<64x512xf32>
    %5 = arith.addf %2, %4 : vector<64x512xf32>
    %c0_5 = arith.constant 0 : index
    %c0_6 = arith.constant 0 : index
    %6 = vector.load %arg5[%c0_5, %c0_6] : memref<64x512xf32, #tpu.memory_space<vmem>>, vector<64x512xf32>
    tpu.vector_store %arg5[%c0_5, %c0_6], %5 {strides = array<i32>} : memref<64x512xf32, #tpu.memory_space<vmem>>, vector<64x512xf32>,
    return
  }
  func.func @transform_0(%arg0: i32, %arg1: i32) -> (i32, i32) {
    %c0_i32 = arith.constant 0 : i32
    %c0_i32_0 = arith.constant 0 : i32
    return %arg0, %c0_i32 : i32, i32
  }
  func.func @transform_1(%arg0: i32, %arg1: i32) -> (i32, i32) {
    %c0_i32 = arith.constant 0 : i32
    %c0_i32_0 = arith.constant 0 : i32
    return %c0_i32, %arg1 : i32, i32
  }
  func.func @transform_2(%arg0: i32, %arg1: i32) -> (i32, i32) {
    %c0_i32 = arith.constant 0 : i32
    %c0_i32_0 = arith.constant 0 : i32
    return %c0_i32, %arg1 : i32, i32
  }
  func.func @transform_3(%arg0: i32, %arg1: i32) -> (i32, i32) {
    %c0_i32 = arith.constant 0 : i32
    return %arg0, %arg1 : i32, i32
  }
}

</mosaic_0001>

<bundles_post_ra>
// kernel: tpu_custom_call.1
= control target key start
LH: loop header
LB: loop body
LE: loop exit
PB: predicated region body
PF: predicated region fallthrough
CT: control target
= control target key end

     0   :  { %8 = vsyncpa [#allocation3], 0  ;;  %s1423_s0 = inlined_call_operand.hbm [shape: f32[64,128], index: 0, kind: input, shape index: {}]   ;;  %s1424_s1 = inlined_call_operand.hbm [shape: f32[128,1024], index: 1, kind: input, shape index: {}]   ;;  %s1425_s2 = inlined_call_operand.hbm [shape: f32[1,1024], index: 2, kind: input, shape index: {}]   ;;  %s1426_s3 = inlined_call_operand.hbm [shape: f32[64,1024], index: 3, kind: output, shape index: {}]  }
   0x1   :  { %9 = vsyncpa [#allocation6], 0 }
   0x2   :  { %11 = vsyncpa [#allocation6 + $0x1], 0 }
   0x3   :  { %12 = vsyncpa [#allocation4], 0 }
   0x4   :  { %14 = vsyncpa [#allocation4 + $0x1], 0  ;;  %s1065_s12 = smov 0   ;;  %s1067_s13 = smov 0  }
   0x5   :  { %s1069_s14 = smov 0   ;;  %s1071_s15 = smov 0  }
   0x6   :  { %s1073_s16 = smov 0   ;;  %s1075_s17 = smov 0  }
   0x7 LB: > { %s29_s18 = sadd.s32 1, %s1026_s16  ;;  %s65_s19 = sadd.s32 1, %s1018_s14  ;;  %s1030_s17 = sphi %s1075_s17, %s20_s17   ;;  %s1026_s16 = sphi %s1073_s16, %s1446_s16   ;;  %s1022_s15 = sphi %s1071_s15, %s1445_s15   ;;  %s1018_s14 = sphi %s1069_s14, %s1444_s14   ;;  %s1014_s13 = sphi %s1067_s13, %s1443_s13   ;;  %s1010_s12 = sphi %s1065_s12, %s1442_s12  }
   0x8   : > { %p30_p0 = scmp.ge.s32.totalorder %s29_s18, 2  ;;  %p72_p1 = scmp.ne.s32.totalorder %s1018_s14, %s1014_s13 }
   0x9   : > { %p73_p2 = scmp.eq.s32.totalorder %s1030_s17, 0  ;;  %p803_p5 = scmp.lt.s32.totalorder %s1030_s17, 2 }
   0xa   : > { %s1448_s18 = smov (%p30_p0, %s29_s18), 0  ;;  %s172_s21 = sand.u32 1, %s1030_s17  }
   0xb   : > { %p74_p4 = por %p73_p2, %p72_p1  ;;  %s62_s20 = ssub.s32 %s1026_s16, %s1448_s18 }
   0xc   : > { %p63_p6 = scmp.eq.s32.totalorder %s62_s20, 0  ;;  %s174_s22 = sand.u32 1, %s1018_s14  }
   0xd   : > { %s774_s23 = sshll.u32 %s1026_s16, 9  ;;  %s758_s25 = sshll.u32 %s174_s22, 9 }
   0xe   : > { %s1113_s24 = scalar_select %p63_p6, %s1018_s14, %s65_s19  }
   0xf   : > { %s182_s28 = scalar_lea.hbm %s1424_s1, %s774_s23  ;;  %p1120_p7 = pnand %p803_p5, %p74_p4 }
  0x10   : > { %s176_s30 = scalar_lea.vmem [#allocation5], %s758_s25  ;;  %s1124_s5 = scalar_lea.sflag [#allocation6], %s172_s21 }
  0x11   : > { %s183_s4 = sshll.u32 %s176_s30, 4  ;;  %p1428_p8 = pneg %p1120_p7  ;;  %s184_s4 = int_to_ptr.vmem [resolvable:$true] %s183_s4 }
  0x12   : > { %s877_s6 = scalar_lea.vmem %s184_s4, 8192  ;;  %s1032_s7 = smov [#allocation5]  }
  0x13   : > { %p878_p9 = scmp.ne.s32.totalorder %s184_s4, %s877_s6  ;;  %s882_s8 = sshll.u32 %s1032_s7, 4  ;;  %s883_s8 = int_to_ptr.vmem [resolvable:$false] %s882_s8 }
  0x14   : > { %s884_s9 = scalar_lea.vmem %s883_s8, 16384  ;;  %p885_p12 = scmp.lt.s32.totalorder %s184_s4, %s883_s8 }
  0x15   : > { %p880_p10 = pnand %p878_p9, %p1428_p8  ;;  %p886_p13 = scmp.lt.s32.totalorder %s884_s9, %s877_s6 }
  0x17   : > { %p881_p11 = pneg %p880_p10  ;;  %p887_p0 = por %p886_p13, %p885_p12 }
  0x19   : > { %p888_p2 = pnand %p887_p0, %p881_p11 }
  0x1b   : > { %891 = shalt.err (!%p888_p2)
}
  0x1c   : > { %s1033_s10 = smov 1024   ;;  %s1034_s11 = smov 512  }
  0x1d   : > { %s1035_s19 = smov 32   ;;  %s1135_s20 = sadd.s32 4294967295, %s1030_s17  }
  0x1e   : > { %794 = dma.hbm_to_vmem [thread:$0]  (!%p1120_p7), %s182_s28, 8192, %s184_s4, %s1124_s5, %s1033_s10, %s1034_s11, %s1035_s19  }
  0x1f   : > { %s754_s21 = sadd.s32 4294967294, %s1030_s17   ;;  %p78_p4 = scmp.ne.s32.totalorder %s1014_s13, %s1010_s12 }
  0x20   : > { %p1427_p5 = scmp.eq.s32.totalorder %s1135_s20, 0  ;;  %p130_p6 = scmp.eq.s32.totalorder %s1135_s20, 1 }
  0x21   : > { %p136_p9 = scmp.eq.s32.totalorder %s754_s21, 1  ;;  %p755_p11 = scmp.ge.s32.totalorder %s1030_s17, 1 }
  0x22   : > { %p1144_p10 = por %p1427_p5, %p78_p4  ;;  %p1152_p12 = por %p130_p6, %p72_p1 }
  0x23   : > { %p1156_p13 = por %p136_p9, %p78_p4  ;;  %p143_p0 = scmp.lt.s32.totalorder %s1030_s17, 3 }
  0x24   : > { %s1432_s25 = scalar_select %p1152_p12, 1, 0 }
  0x25   : > { %s1433_s26 = scalar_select %p1156_p13, 1, 0 }
  0x26   : > { %p1161_p2 = pnand %p755_p11, %p143_p0  ;;  %s1036_s28 = smov [#allocation2]  }
  0x27   : > { %s158_s30 = sshll.u32 %s1036_s28, 4  ;;  %s761_s4 = sshll.u32 %s174_s22, 2  ;;  %s159_s30 = int_to_ptr.vmem [resolvable:$true] %s158_s30 }
  0x28   : > { %p787_p3 = pneg %p1161_p2  ;;  %s775_s6 = sshll.u32 %s1026_s16, 6 }
  0x29   : > { %s1179_s10 = scalar_lea.hbm %s1425_s2, %s775_s6  ;;  %s197_s11 = scalar_lea.vmem [#allocation7], %s761_s4 }
  0x2a   : > { %p1172_p1 = pnand %p787_p3, %p1427_p5  ;;  %s205_s19 = sshll.u32 %s197_s11, 4  ;;  %s206_s19 = int_to_ptr.vmem [resolvable:$true] %s205_s19 }
  0x2b   : > { %s903_s21 = scalar_lea.vmem %s159_s30, 1024  ;;  %p911_p0 = scmp.lt.s32.totalorder %s159_s30, %s159_s30 }
  0x2c   : > { %p894_p4 = pneg %p1172_p1  ;;  %p904_p6 = scmp.ne.s32.totalorder %s159_s30, %s903_s21 }
  0x2d   : > { %p912_p3 = scmp.lt.s32.totalorder %s903_s21, %s903_s21 }
  0x2e   : > { %p906_p9 = pnand %p904_p6, %p894_p4 }
  0x2f   : > { %p913_p5 = por %p912_p3, %p911_p0 }
  0x30   : > { %p907_p11 = pneg %p906_p9 }
  0x32   : > { %p914_p8 = pnand %p913_p5, %p907_p11 }
  0x34   : > { %917 = shalt.err (!%p914_p8)
}
  0x35   : > { %s1037_s22 = smov 128   ;;  %s1038_s28 = smov 8  }
  0x36   : > { %790 = dma.hbm_to_vmem [thread:$0]  (!%p1172_p1), %s1423_s0, 1024, %s159_s30, [#allocation3], %s1037_s22, %s1037_s22, %s1038_s28  }
  0x37   : > { %s931_s8 = scalar_lea.vmem %s206_s19, 64  ;;  %p1436_p12 = pneg %p1120_p7 }
  0x38   : > { %p932_p13 = scmp.ne.s32.totalorder %s206_s19, %s931_s8  ;;  %s1039_s9 = smov [#allocation7]  }
  0x39   : > { %s936_s11 = sshll.u32 %s1039_s9, 4  ;;  %s937_s11 = int_to_ptr.vmem [resolvable:$false] %s936_s11 }
  0x3a   : > { %p934_p4 = pnand %p932_p13, %p1436_p12  ;;  %s938_s21 = scalar_lea.vmem %s937_s11, 128 }
  0x3b   : > { %p939_p8 = scmp.lt.s32.totalorder %s206_s19, %s937_s11  ;;  %p940_p5 = scmp.lt.s32.totalorder %s938_s21, %s931_s8 }
  0x3c   : > { %p935_p6 = pneg %p934_p4 }
  0x3d   : > { %p941_p9 = por %p940_p5, %p939_p8 }
  0x3f   : > { %p942_p11 = pnand %p941_p9, %p935_p6 }
  0x41   : > { %945 = shalt.err (!%p942_p11)
}
  0x42   : > { %797 = dma.hbm_to_vmem [thread:$0]  (!%p1120_p7), %s1179_s10, 64, %s206_s19, %s1124_s5  }
  0x43   : > { %214 = sbr.rel (%p1161_p2) target bundleno = 351 (0x15f), region = 32  ;;  %p1437_p12 = scmp.eq.s32.totalorder (!%p1161_p2), %s1135_s20, 0 }
  0x48   : > { %997 = dma.done.wait (%p1437_p12), [#allocation3], 1024   ;;  %p1438_p13 = pmov %p1437_p12 }
  0x49   : > { %s220_s30 = sand.u32 1, %s1135_s20   ;;  %s1203_s7 = sand.u32 1, %s1014_s13  }
  0x4a   : > { %999 = vsyncadd (%p1438_p13), [#allocation3], 4294966272  ;;  %s766_s29 = sshll.u32 %s1203_s7, 9  ;;  %s221_s22 = scalar_lea.sflag [#allocation6], %s220_s30 }
  0x4b   : > { %s1206_s28 = scalar_lea.vmem [#allocation5], %s766_s29 }
  0x4c   : > { %1001 = dma.done.wait (%p1144_p10), %s221_s22, 8256  }
  0x4d   : > { %1003 = vsyncadd (%p1144_p10), %s221_s22, 4294959040  ;;  %v1040_v0 = vmov 0.0   ;;  %v335_v1 = vld [vmem:[%s1206_s28 + $0x1e8] sm:$0xff]  ;;  %v337_v2 = vld [vmem:[%s1206_s28 + $0x1f8] sm:$0xff]  ;;  %s767_s5 = sshll.u32 %s1203_s7, 2  ;;  %s768_s23 = sshll.u32 %s1203_s7, 8 }
  0x4e   : > { %424 = vmatprep.mubr.f32.mxu0 %v1040_v0  ;;  %537 = vmatprep.mubr.f32.mxu1 %v1040_v0  ;;  %v334_v3 = vld [vmem:[%s1206_s28 + $0x1e0] sm:$0xff]  ;;  %v336_v4 = vld [vmem:[%s1206_s28 + $0x1f0] sm:$0xff]  ;;  %v331_v5 = vld [vmem:[%s1206_s28 + $0x1c8] sm:$0xff]  ;;  %s233_s20 = scalar_lea.vmem [#allocation7], %s767_s5  ;;  %s1304_s27 = scalar_lea.vmem [#allocation8], %s768_s23 }
  0x4f   : > { %360 = vmatprep.subr.mxu0 %v335_v1  ;;  %473 = vmatprep.subr.mxu1 %v337_v2  ;;  %v333_v6 = vld [vmem:[%s1206_s28 + $0x1d8] sm:$0xff]  ;;  %v330_v7 = vld [vmem:[%s1206_s28 + $0x1c0] sm:$0xff]  ;;  %v332_v8 = vld [vmem:[%s1206_s28 + $0x1d0] sm:$0xff]  ;;  %s776_s10 = sshll.u32 %s1022_s15, 9  ;;  %s635_s19 = sshll.u32 %s1304_s27, 4  ;;  %s1369_s19 = int_to_ptr.vmem [resolvable:$true] %s635_s19 }
  0x50   : > { %361 = vmatpush1.msra.mxu0 %v334_v3  ;;  %474 = vmatpush1.msra.mxu1 %v336_v4  ;;  %v327_v9 = vld [vmem:[%s1206_s28 + $0x1a8] sm:$0xff]  ;;  %v329_v10 = vld [vmem:[%s1206_s28 + $0x1b8] sm:$0xff]  ;;  %v326_v11 = vld [vmem:[%s1206_s28 + $0x1a0] sm:$0xff]  ;;  %s1367_s4 = scalar_lea.hbm %s1426_s3, %s776_s10  ;;  %s619_s8 = scalar_lea.sflag [#allocation4], %s1203_s7 }
  0x51   : > { %362 = vmatprep.subr.mxu0 %v331_v5  ;;  %475 = vmatprep.subr.mxu1 %v333_v6  ;;  %v328_v12 = vld [vmem:[%s1206_s28 + $0x1b0] sm:$0xff]  ;;  %v323_v13 = vld [vmem:[%s1206_s28 + $0x188] sm:$0xff]  ;;  %v325_v14 = vld [vmem:[%s1206_s28 + $0x198] sm:$0xff]  ;;  %s946_s9 = scalar_lea.vmem %s1369_s19, 4096  ;;  %p1439_p10 = scmp.ne.s32.totalorder %s1432_s25, 0 }
  0x52   : > { %363 = vmatpush1.msra.mxu0 %v330_v7  ;;  %476 = vmatpush1.msra.mxu1 %v332_v8  ;;  %v322_v15 = vld [vmem:[%s1206_s28 + $0x180] sm:$0xff]  ;;  %v324_v16 = vld [vmem:[%s1206_s28 + $0x190] sm:$0xff]  ;;  %v319_v17 = vld [vmem:[%s1206_s28 + $0x168] sm:$0xff]  ;;  %p947_p7 = scmp.ne.s32.totalorder %s1369_s19, %s946_s9  ;;  %s1041_s11 = smov [#allocation8]  }
  0x53   : > { %364 = vmatprep.subr.mxu0 %v327_v9  ;;  %477 = vmatprep.subr.mxu1 %v329_v10  ;;  %v321_v18 = vld [vmem:[%s1206_s28 + $0x178] sm:$0xff]  ;;  %v318_v19 = vld [vmem:[%s1206_s28 + $0x160] sm:$0xff]  ;;  %v320_v20 = vld [vmem:[%s1206_s28 + $0x170] sm:$0xff]  ;;  %v340_v10 = vlaneseq  ;;  %s950_s21 = sshll.u32 %s1041_s11, 4  ;;  %s951_s21 = int_to_ptr.vmem [resolvable:$false] %s950_s21 }
  0x54   : > { %365 = vmatpush1.msra.mxu0 %v326_v11  ;;  %478 = vmatpush1.msra.mxu1 %v328_v12  ;;  %v315_v21 = vld [vmem:[%s1206_s28 + $0x148] sm:$0xff]  ;;  %v317_v22 = vld [vmem:[%s1206_s28 + $0x158] sm:$0xff]  ;;  %v314_v23 = vld [vmem:[%s1206_s28 + $0x140] sm:$0xff]  ;;  %p948_p2 = pnand %p947_p7, %p1439_p10  ;;  %s952_s30 = scalar_lea.vmem %s951_s21, 8192 }
  0x55   : > { %366 = vmatprep.subr.mxu0 %v323_v13  ;;  %479 = vmatprep.subr.mxu1 %v325_v14  ;;  %v316_v24 = vld [vmem:[%s1206_s28 + $0x150] sm:$0xff]  ;;  %v311_v25 = vld [vmem:[%s1206_s28 + $0x128] sm:$0xff]  ;;  %v313_v26 = vld [vmem:[%s1206_s28 + $0x138] sm:$0xff]  ;;  %v341_v11 = vshrl.u32 %v340_v10, 7  ;;  %p953_p0 = scmp.lt.s32.totalorder %s1369_s19, %s951_s21  ;;  %p954_p3 = scmp.lt.s32.totalorder %s952_s30, %s946_s9 }
  0x56   : > { %367 = vmatpush1.msra.mxu0 %v322_v15  ;;  %480 = vmatpush1.msra.mxu1 %v324_v16  ;;  %v310_v27 = vld [vmem:[%s1206_s28 + $0x120] sm:$0xff]  ;;  %v312_v28 = vld [vmem:[%s1206_s28 + $0x130] sm:$0xff]  ;;  %v307_v29 = vld [vmem:[%s1206_s28 + $0x108] sm:$0xff]  ;;  %p949_p1 = pneg %p948_p2 }
  0x57   : > { %368 = vmatprep.subr.mxu0 %v319_v17  ;;  %481 = vmatprep.subr.mxu1 %v321_v18  ;;  %v309_v30 = vld [vmem:[%s1206_s28 + $0x118] sm:$0xff]  ;;  %v306_v31 = vld [vmem:[%s1206_s28 + $0x100] sm:$0xff]  ;;  %v308_v32 = vld [vmem:[%s1206_s28 + $0x110] sm:$0xff]  ;;  %v342_v12 = vsub.s32 0, %v341_v11  ;;  %v350_v13 = vsub.s32 2, %v341_v11  ;;  %v346_v15 = vsub.s32 1, %v341_v11  ;;  %p955_p4 = por %p954_p3, %p953_p0 }
  0x58   : > { %369 = vmatpush1.msra.mxu0 %v318_v19  ;;  %482 = vmatpush1.msra.mxu1 %v320_v20  ;;  %v303_v33 = vld [vmem:[%s1206_s28 + $0xe8] sm:$0xff]  ;;  %v305_v34 = vld [vmem:[%s1206_s28 + $0xf8] sm:$0xff]  ;;  %v302_v35 = vld [vmem:[%s1206_s28 + $0xe0] sm:$0xff]  ;;  %v354_v16 = vsub.s32 3, %v341_v11 }
  0x59   : > { %370 = vmatprep.subr.mxu0 %v315_v21  ;;  %483 = vmatprep.subr.mxu1 %v317_v22  ;;  %v304_v36 = vld [vmem:[%s1206_s28 + $0xf0] sm:$0xff]  ;;  %v299_v37 = vld [vmem:[%s1206_s28 + $0xc8] sm:$0xff]  ;;  %v301_v38 = vld [vmem:[%s1206_s28 + $0xd8] sm:$0xff]  ;;  %p956_p6 = pnand %p955_p4, %p949_p1 }
  0x5a   : > { %371 = vmatpush1.msra.mxu0 %v314_v23  ;;  %484 = vmatpush1.msra.mxu1 %v316_v24  ;;  %v298_v39 = vld [vmem:[%s1206_s28 + $0xc0] sm:$0xff]  ;;  %v300_v40 = vld [vmem:[%s1206_s28 + $0xd0] sm:$0xff]  ;;  %v295_v41 = vld [vmem:[%s1206_s28 + $0xa8] sm:$0xff] }
  0x5b   : > { %372 = vmatprep.subr.mxu0 %v311_v25  ;;  %485 = vmatprep.subr.mxu1 %v313_v26  ;;  %v297_v42 = vld [vmem:[%s1206_s28 + $0xb8] sm:$0xff]  ;;  %v294_v43 = vld [vmem:[%s1206_s28 + $0xa0] sm:$0xff]  ;;  %v296_v44 = vld [vmem:[%s1206_s28 + $0xb0] sm:$0xff] }
  0x5c   : > { %373 = vmatpush1.msra.mxu0 %v310_v27  ;;  %486 = vmatpush1.msra.mxu1 %v312_v28  ;;  %v291_v45 = vld [vmem:[%s1206_s28 + $0x88] sm:$0xff]  ;;  %v293_v46 = vld [vmem:[%s1206_s28 + $0x98] sm:$0xff]  ;;  %v290_v47 = vld [vmem:[%s1206_s28 + $0x80] sm:$0xff] }
  0x5d   : > { %374 = vmatprep.subr.mxu0 %v307_v29  ;;  %487 = vmatprep.subr.mxu1 %v309_v30  ;;  %v292_v48 = vld [vmem:[%s1206_s28 + $0x90] sm:$0xff]  ;;  %v287_v49 = vld [vmem:[%s1206_s28 + $0x68] sm:$0xff]  ;;  %v289_v50 = vld [vmem:[%s1206_s28 + $0x78] sm:$0xff] }
  0x5e   : > { %375 = vmatpush1.msra.mxu0 %v306_v31  ;;  %488 = vmatpush1.msra.mxu1 %v308_v32  ;;  %v286_v51 = vld [vmem:[%s1206_s28 + $0x60] sm:$0xff]  ;;  %v288_v52 = vld [vmem:[%s1206_s28 + $0x70] sm:$0xff]  ;;  %v283_v53 = vld [vmem:[%s1206_s28 + $0x48] sm:$0xff] }
  0x5f   : > { %376 = vmatprep.subr.mxu0 %v303_v33  ;;  %489 = vmatprep.subr.mxu1 %v305_v34  ;;  %v285_v54 = vld [vmem:[%s1206_s28 + $0x58] sm:$0xff]  ;;  %v282_v55 = vld [vmem:[%s1206_s28 + $0x40] sm:$0xff]  ;;  %v284_v56 = vld [vmem:[%s1206_s28 + $0x50] sm:$0xff] }
  0x60   : > { %377 = vmatpush1.msra.mxu0 %v302_v35  ;;  %490 = vmatpush1.msra.mxu1 %v304_v36  ;;  %v279_v57 = vld [vmem:[%s1206_s28 + $0x28] sm:$0xff]  ;;  %v281_v58 = vld [vmem:[%s1206_s28 + $0x38] sm:$0xff]  ;;  %v278_v59 = vld [vmem:[%s1206_s28 + $0x20] sm:$0xff] }
  0x61   : > { %378 = vmatprep.subr.mxu0 %v299_v37  ;;  %491 = vmatprep.subr.mxu1 %v301_v38  ;;  %v280_v60 = vld [vmem:[%s1206_s28 + $0x30] sm:$0xff]  ;;  %v275_v61 = vld [vmem:[%s1206_s28 + $0x8] sm:$0xff]  ;;  %v277_v62 = vld [vmem:[%s1206_s28 + $0x18] sm:$0xff] }
  0x62   : > { %379 = vmatpush1.msra.mxu0 %v298_v39  ;;  %492 = vmatpush1.msra.mxu1 %v300_v40  ;;  %v274_v63 = vld [vmem:[%s1206_s28] sm:$0xff]  ;;  %v276_v1 = vld [vmem:[%s1206_s28 + $0x10] sm:$0xff]  ;;  %v267_v3 = vld [vmem:[#allocation2 + $0x8] sm:$0xff] }
  0x63   : > { %380 = vmatprep.subr.mxu0 %v295_v41  ;;  %493 = vmatprep.subr.mxu1 %v297_v42  ;;  %v266_v2 = vld [vmem:[#allocation2] sm:$0xff]  ;;  %v268_v4 = vld [vmem:[#allocation2 + $0x10] sm:$0xff]  ;;  %v269_v5 = vld [vmem:[#allocation2 + $0x18] sm:$0xff] }
  0x64   : > { %381 = vmatpush1.msra.mxu0 %v294_v43  ;;  %494 = vmatpush1.msra.mxu1 %v296_v44  ;;  %v270_v6 = vld [vmem:[#allocation2 + $0x20] sm:$0xff]  ;;  %v271_v7 = vld [vmem:[#allocation2 + $0x28] sm:$0xff]  ;;  %v272_v8 = vld [vmem:[#allocation2 + $0x30] sm:$0xff] }
  0x65   : > { %382 = vmatprep.subr.mxu0 %v291_v45  ;;  %495 = vmatprep.subr.mxu1 %v293_v46  ;;  %v273_v9 = vld [vmem:[#allocation2 + $0x38] sm:$0xff]  ;;  %v338_v14 = vld [vmem:[%s233_s20] sm:$0xf] }
  0x66   : > { %383 = vmatpush1.msra.mxu0 %v290_v47  ;;  %496 = vmatpush1.msra.mxu1 %v292_v48  ;;  %v1294_v17 = vrot.slane %v338_v14, %v342_v12  ;;  %v1296_v18 = vrot.slane %v338_v14, %v350_v13  ;;  %v1298_v19 = vrot.slane %v338_v14, %v346_v15 }
  0x67   : > { %384 = vmatprep.subr.mxu0 %v287_v49  ;;  %497 = vmatprep.subr.mxu1 %v289_v50 }
  0x68   : > { %385 = vmatpush1.msra.mxu0 %v286_v51  ;;  %498 = vmatpush1.msra.mxu1 %v288_v52 }
  0x69   : > { %386 = vmatprep.subr.mxu0 %v283_v53  ;;  %499 = vmatprep.subr.mxu1 %v285_v54 }
  0x6a   : > { %387 = vmatpush1.msra.mxu0 %v282_v55  ;;  %500 = vmatpush1.msra.mxu1 %v284_v56 }
  0x6b   : > { %388 = vmatprep.subr.mxu0 %v279_v57  ;;  %501 = vmatprep.subr.mxu1 %v281_v58 }
  0x6c   : > { %389 = vmatpush1.msra.mxu0 %v278_v59  ;;  %502 = vmatpush1.msra.mxu1 %v280_v60 }
  0x6d   : > { %390 = vmatprep.subr.mxu0 %v275_v61  ;;  %503 = vmatprep.subr.mxu1 %v277_v62 }
  0x6e   : > { %391 = vmatpush1.msra.mxu0 %v274_v63  ;;  %504 = vmatpush1.msra.mxu1 %v276_v1 }
  0x6f   : > { %425 = vmatmul.mubr.f32.vlgmr.msra.gmra.mxu0 %v266_v2  ;;  %538 = vmatmul.mubr.f32.vlgmr.msra.gmra.mxu1 %v266_v2 }
  0x70   : > { %430 = vmatprep.mubr.f32.mxu0 %v1040_v0  ;;  %543 = vmatprep.mubr.f32.mxu1 %v1040_v0 }
  0x73   : > { %431 = vmatmul.mubr.f32.gmra.mxu0 %v267_v3  ;;  %544 = vmatmul.mubr.f32.gmra.mxu1 %v267_v3 }
  0x74   : > { %436 = vmatprep.mubr.f32.mxu0 %v1040_v0  ;;  %549 = vmatprep.mubr.f32.mxu1 %v1040_v0 }
  0x77   : > { %437 = vmatmul.mubr.f32.gmra.mxu0 %v268_v4  ;;  %550 = vmatmul.mubr.f32.gmra.mxu1 %v268_v4 }
  0x78   : > { %442 = vmatprep.mubr.f32.mxu0 %v1040_v0  ;;  %555 = vmatprep.mubr.f32.mxu1 %v1040_v0 }
  0x7b   : > { %443 = vmatmul.mubr.f32.gmra.mxu0 %v269_v5  ;;  %556 = vmatmul.mubr.f32.gmra.mxu1 %v269_v5 }
  0x7c   : > { %448 = vmatprep.mubr.f32.mxu0 %v1040_v0  ;;  %561 = vmatprep.mubr.f32.mxu1 %v1040_v0 }
  0x7f   : > { %449 = vmatmul.mubr.f32.gmra.mxu0 %v270_v6  ;;  %562 = vmatmul.mubr.f32.gmra.mxu1 %v270_v6 }
  0x80   : > { %454 = vmatprep.mubr.f32.mxu0 %v1040_v0  ;;  %567 = vmatprep.mubr.f32.mxu1 %v1040_v0 }
  0x83   : > { %455 = vmatmul.mubr.f32.gmra.mxu0 %v271_v7  ;;  %568 = vmatmul.mubr.f32.gmra.mxu1 %v271_v7 }
  0x84   : > { %460 = vmatprep.mubr.f32.mxu0 %v1040_v0  ;;  %573 = vmatprep.mubr.f32.mxu1 %v1040_v0 }
  0x87   : > { %461 = vmatmul.mubr.f32.gmra.mxu0 %v272_v8  ;;  %574 = vmatmul.mubr.f32.gmra.mxu1 %v272_v8 }
  0x88   : > { %466 = vmatprep.mubr.f32.mxu0 %v1040_v0  ;;  %579 = vmatprep.mubr.f32.mxu1 %v1040_v0  ;;  %v1300_v0 = vrot.slane %v338_v14, %v354_v16 }
  0x8b   : > { %467 = vmatmul.mubr.f32.gmra.mxu0 %v273_v9  ;;  %580 = vmatmul.mubr.f32.gmra.mxu1 %v273_v9 }
 0x12f   : > { %v426_v20 = vpop.f32.mrf.mxu0  ;;  %v539_v21 = vpop.f32.mrf.mxu1 }
 0x130   : > { %v427_v22 = vadd.f32 %v426_v20, %v1294_v17  ;;  %v540_v23 = vadd.f32 %v539_v21, %v1296_v18 }
 0x131   : > { %v428_v24 = vpop.f32.mrf.mxu0  ;;  %v541_v25 = vpop.f32.mrf.mxu1 }
 0x132   : > { %586 = vst [vmem:[%s1304_s27] sm:$0xff] %v427_v22  ;;  %588 = vst [vmem:[%s1304_s27 + $0x10] sm:$0xff] %v540_v23  ;;  %v429_v26 = vadd.f32 %v428_v24, %v1298_v19  ;;  %v542_v27 = vadd.f32 %v541_v25, %v1300_v0 }
 0x133   : > { %v432_v28 = vpop.f32.mrf.mxu0  ;;  %v545_v29 = vpop.f32.mrf.mxu1 }
 0x134   : > { %587 = vst [vmem:[%s1304_s27 + $0x8] sm:$0xff] %v429_v26  ;;  %589 = vst [vmem:[%s1304_s27 + $0x18] sm:$0xff] %v542_v27  ;;  %v433_v30 = vadd.f32 %v432_v28, %v1294_v17  ;;  %v546_v31 = vadd.f32 %v545_v29, %v1296_v18 }
 0x135   : > { %v434_v32 = vpop.f32.mrf.mxu0  ;;  %v547_v33 = vpop.f32.mrf.mxu1 }
 0x136   : > { %590 = vst [vmem:[%s1304_s27 + $0x20] sm:$0xff] %v433_v30  ;;  %592 = vst [vmem:[%s1304_s27 + $0x30] sm:$0xff] %v546_v31  ;;  %v435_v34 = vadd.f32 %v434_v32, %v1298_v19  ;;  %v548_v35 = vadd.f32 %v547_v33, %v1300_v0 }
 0x137   : > { %v438_v36 = vpop.f32.mrf.mxu0  ;;  %v551_v37 = vpop.f32.mrf.mxu1 }
 0x138   : > { %591 = vst [vmem:[%s1304_s27 + $0x28] sm:$0xff] %v435_v34  ;;  %593 = vst [vmem:[%s1304_s27 + $0x38] sm:$0xff] %v548_v35  ;;  %v439_v38 = vadd.f32 %v438_v36, %v1294_v17  ;;  %v552_v39 = vadd.f32 %v551_v37, %v1296_v18 }
 0x139   : > { %v440_v40 = vpop.f32.mrf.mxu0  ;;  %v553_v41 = vpop.f32.mrf.mxu1 }
 0x13a   : > { %594 = vst [vmem:[%s1304_s27 + $0x40] sm:$0xff] %v439_v38  ;;  %596 = vst [vmem:[%s1304_s27 + $0x50] sm:$0xff] %v552_v39  ;;  %v441_v42 = vadd.f32 %v440_v40, %v1298_v19  ;;  %v554_v43 = vadd.f32 %v553_v41, %v1300_v0 }
 0x13b   : > { %v444_v44 = vpop.f32.mrf.mxu0  ;;  %v557_v45 = vpop.f32.mrf.mxu1 }
 0x13c   : > { %595 = vst [vmem:[%s1304_s27 + $0x48] sm:$0xff] %v441_v42  ;;  %597 = vst [vmem:[%s1304_s27 + $0x58] sm:$0xff] %v554_v43  ;;  %v445_v46 = vadd.f32 %v444_v44, %v1294_v17  ;;  %v558_v47 = vadd.f32 %v557_v45, %v1296_v18 }
 0x13d   : > { %v446_v48 = vpop.f32.mrf.mxu0  ;;  %v559_v49 = vpop.f32.mrf.mxu1 }
 0x13e   : > { %598 = vst [vmem:[%s1304_s27 + $0x60] sm:$0xff] %v445_v46  ;;  %600 = vst [vmem:[%s1304_s27 + $0x70] sm:$0xff] %v558_v47  ;;  %v447_v50 = vadd.f32 %v446_v48, %v1298_v19  ;;  %v560_v51 = vadd.f32 %v559_v49, %v1300_v0 }
 0x13f   : > { %v450_v52 = vpop.f32.mrf.mxu0  ;;  %v563_v53 = vpop.f32.mrf.mxu1 }
 0x140   : > { %599 = vst [vmem:[%s1304_s27 + $0x68] sm:$0xff] %v447_v50  ;;  %601 = vst [vmem:[%s1304_s27 + $0x78] sm:$0xff] %v560_v51  ;;  %v451_v54 = vadd.f32 %v450_v52, %v1294_v17  ;;  %v564_v55 = vadd.f32 %v563_v53, %v1296_v18 }
 0x141   : > { %v452_v56 = vpop.f32.mrf.mxu0  ;;  %v565_v57 = vpop.f32.mrf.mxu1 }
 0x142   : > { %602 = vst [vmem:[%s1304_s27 + $0x80] sm:$0xff] %v451_v54  ;;  %604 = vst [vmem:[%s1304_s27 + $0x90] sm:$0xff] %v564_v55  ;;  %v453_v58 = vadd.f32 %v452_v56, %v1298_v19  ;;  %v566_v59 = vadd.f32 %v565_v57, %v1300_v0 }
 0x143   : > { %v456_v60 = vpop.f32.mrf.mxu0  ;;  %v569_v61 = vpop.f32.mrf.mxu1 }
 0x144   : > { %603 = vst [vmem:[%s1304_s27 + $0x88] sm:$0xff] %v453_v58  ;;  %605 = vst [vmem:[%s1304_s27 + $0x98] sm:$0xff] %v566_v59  ;;  %v457_v62 = vadd.f32 %v456_v60, %v1294_v17  ;;  %v570_v63 = vadd.f32 %v569_v61, %v1296_v18 }
 0x145   : > { %v458_v1 = vpop.f32.mrf.mxu0  ;;  %v571_v2 = vpop.f32.mrf.mxu1 }
 0x146   : > { %606 = vst [vmem:[%s1304_s27 + $0xa0] sm:$0xff] %v457_v62  ;;  %608 = vst [vmem:[%s1304_s27 + $0xb0] sm:$0xff] %v570_v63  ;;  %v459_v3 = vadd.f32 %v458_v1, %v1298_v19  ;;  %v572_v4 = vadd.f32 %v571_v2, %v1300_v0 }
 0x147   : > { %v462_v5 = vpop.f32.mrf.mxu0  ;;  %v575_v6 = vpop.f32.mrf.mxu1 }
 0x148   : > { %607 = vst [vmem:[%s1304_s27 + $0xa8] sm:$0xff] %v459_v3  ;;  %609 = vst [vmem:[%s1304_s27 + $0xb8] sm:$0xff] %v572_v4  ;;  %v463_v7 = vadd.f32 %v462_v5, %v1294_v17  ;;  %v576_v8 = vadd.f32 %v575_v6, %v1296_v18 }
 0x149   : > { %v464_v9 = vpop.f32.mrf.mxu0  ;;  %v577_v10 = vpop.f32.mrf.mxu1 }
 0x14a   : > { %610 = vst [vmem:[%s1304_s27 + $0xc0] sm:$0xff] %v463_v7  ;;  %612 = vst [vmem:[%s1304_s27 + $0xd0] sm:$0xff] %v576_v8  ;;  %v465_v11 = vadd.f32 %v464_v9, %v1298_v19  ;;  %v578_v12 = vadd.f32 %v577_v10, %v1300_v0 }
 0x14b   : > { %v468_v13 = vpop.f32.mrf.mxu0  ;;  %v581_v14 = vpop.f32.mrf.mxu1 }
 0x14c   : > { %611 = vst [vmem:[%s1304_s27 + $0xc8] sm:$0xff] %v465_v11  ;;  %613 = vst [vmem:[%s1304_s27 + $0xd8] sm:$0xff] %v578_v12  ;;  %v469_v15 = vadd.f32 %v468_v13, %v1294_v17  ;;  %v582_v16 = vadd.f32 %v581_v14, %v1296_v18 }
 0x14d   : > { %v470_v20 = vpop.f32.mrf.mxu0  ;;  %v583_v21 = vpop.f32.mrf.mxu1 }
 0x14e   : > { %614 = vst [vmem:[%s1304_s27 + $0xe0] sm:$0xff] %v469_v15  ;;  %616 = vst [vmem:[%s1304_s27 + $0xf0] sm:$0xff] %v582_v16  ;;  %v471_v22 = vadd.f32 %v470_v20, %v1298_v19  ;;  %v584_v17 = vadd.f32 %v583_v21, %v1300_v0 }
 0x150   : > { %615 = vst [vmem:[%s1304_s27 + $0xe8] sm:$0xff] %v471_v22  ;;  %617 = vst [vmem:[%s1304_s27 + $0xf8] sm:$0xff] %v584_v17 }
 0x151   : > { %959 = shalt.err (!%p956_p6)
}
 0x152   : > { %s960_s29 = scalar_lea.hbm %s1367_s4, 4096  ;;  %s964_s5 = scalar_lea.hbm %s1426_s3, 8192 }
 0x153   : > { %p961_p8 = scmp.ne.s32.totalorder %s1367_s4, %s960_s29  ;;  %p965_p11 = scmp.lt.s32.totalorder %s1367_s4, %s1426_s3 }
 0x154   : > { %p966_p12 = scmp.lt.s32.totalorder %s964_s5, %s960_s29 }
 0x155   : > { %p962_p5 = pnand %p961_p8, %p1439_p10 }
 0x156   : > { %p967_p13 = por %p966_p12, %p965_p11 }
 0x157   : > { %p963_p9 = pneg %p962_p5 }
 0x159   : > { %p968_p7 = pnand %p967_p13, %p963_p9 }
 0x15b   : > { %971 = shalt.err (!%p968_p7)
}
 0x15c   : > { %s1042_s27 = smov 512   ;;  %s1043_s10 = smov 1024  }
 0x15d   : > { %s1044_s15 = smov 32  }
 0x15e   : > { %785 = dma.vmem_to_hbm [thread:$0]  (%p1439_p10), %s1369_s19, 4096, %s1367_s4, %s619_s8, %s1042_s27, %s1043_s10, %s1044_s15  }
 0x15f PF: > { %s650_s6 = sand.u32 1, %s1010_s12   ;;  %p1440_p2 = scmp.ne.s32.totalorder %s1433_s26, 0 }
 0x160   : > { %p1441_p1 = scmp.ge.s32.totalorder %s1030_s17, 2  ;;  %s651_s9 = scalar_lea.sflag [#allocation4], %s650_s6 }
 0x162   : > { %p799_p0 = pnand %p1441_p1, %p1440_p2 }
 0x164   : > { %p800_p3 = pneg %p799_p0 }
 0x166   : > { %1005 = dma.done.wait (%p800_p3), %s651_s9, 4096  }
 0x167   : > { %1007 = vsyncadd (%p800_p3), %s651_s9, 4294963200  ;;  %s20_s17 = sadd.s32 1, %s1030_s17   ;;  %s1442_s12 = smov %s1014_s13 }
 0x168   : > { %p17_p4 = scmp.ge.s32.totalorder %s20_s17, 4   ;;  %s1443_s13 = smov %s1018_s14 }
 0x169   : > { %s1444_s14 = smov %s1113_s24  ;;  %s1445_s15 = smov %s1026_s16 }
 0x16a   : > { %s1446_s16 = smov %s1448_s18  ;;  %19 = sbr.rel (!%p17_p4) target bundleno = 7 (0x7), region = 94 }
 0x16f   :  { %656 = vsyncpa [#allocation3], 1 }
 0x170   :  { %658 = vsyncpa [#allocation3 + $0x1], 1 }
 0x171   :  { %659 = vsyncpa [#allocation6], 1 }
 0x172   :  { %661 = vsyncpa [#allocation6 + $0x1], 1 }
 0x173   :  { %662 = vsyncpa [#allocation4], 1 }
 0x174   :  { %664 = vsyncpa [#allocation4 + $0x1], 1 }

</bundles_post_ra>
